<compile_context>
chip_gen: v6e
topology: v6e:2x2x1
jax: 0.10.0
libtpu: 0.0.40
codegen_flags: <defaults>
</compile_context>

<pallas_src>
import functools

import jax
import jax.numpy as jnp
from jax.experimental import pallas as pl
from jax.experimental.pallas import tpu as pltpu


_LANE = 128
_SUBLANE = 8
_WS_VMEM_BUDGET = 40 * 2**20          # weight-stationary budget (fits v7x's 64 MiB)


def _pick_tile(dim, max_tile, granule):
    """Largest t <= max_tile with dim % t == 0 and t % granule == 0; otherwise the
    full dim (a block equal to the full array extent is always Mosaic-legal)."""
    if dim <= max_tile:
        return dim
    t = (max_tile // granule) * granule
    while t >= granule:
        if dim % t == 0:
            return t
        t -= granule
    return dim


def _clamp_vmem(est):
    """Explicit scoped-VMEM limit: >= 32 MiB (v5e default is 16 MiB), <= 64 MiB (v7x)."""
    return int(min(max(int(est * 1.25), 32 * 2**20), 64 * 2**20))


# ----------------------------- shared LN math -----------------------------

def _ln_math(y, g, b, eps):
    mu = jnp.mean(y, axis=-1, keepdims=True)
    var = jnp.mean(jnp.square(y - mu), axis=-1, keepdims=True)
    return (y - mu) * jax.lax.rsqrt(var + eps) * g + b


# ----------------------------- tiled K-accumulator matmul (fallback) -----------------------------

def _tiled_linear_kernel(x_ref, w_ref, b_ref, o_ref, acc_ref, *, activation):
    k = pl.program_id(2)

    @pl.when(k == 0)
    def _():
        acc_ref[...] = jnp.zeros_like(acc_ref)

    acc_ref[...] += jnp.dot(x_ref[...], w_ref[...],
                            preferred_element_type=jnp.float32)

    @pl.when(k == pl.num_programs(2) - 1)
    def _():
        y = acc_ref[...] + b_ref[...]
        if activation == "gelu":
            # TODO(synk): switch to erf GELU (approximate=False) for torch.nn.GELU
            # bit-parity once erf lowering is verified on all target generations.
            y = jax.nn.gelu(y, approximate=True)
        elif activation == "tanh":
            y = jnp.tanh(y)
        o_ref[...] = y.astype(o_ref.dtype)


def _tiled_linear(x, w, b, activation, out_dtype, tm=512, tn=512, tk=512):
    """Fallback matmul for weights too large to keep VMEM-resident."""
    M, K = x.shape
    N = w.shape[1]
    tm = _pick_tile(M, tm, _SUBLANE)
    tn = _pick_tile(N, tn, _LANE)
    tk = _pick_tile(K, tk, _LANE)
    est = (2 * tm * tk * 2 + 2 * tk * tn * 2 + 2 * tn * 4 + tm * tn * 4
           + 2 * tm * tn * jnp.dtype(out_dtype).itemsize)
    # TODO(synk): if the bundle shows exposed weight DMA on v6e, raise the W spec to
    # pipeline_mode=pl.Buffered(3).
    return pl.pallas_call(
        functools.partial(_tiled_linear_kernel, activation=activation),
        out_shape=jax.ShapeDtypeStruct((M, N), out_dtype),
        grid=(M // tm, N // tn, K // tk),
        in_specs=[
            pl.BlockSpec((tm, tk), lambda i, j, k: (i, k)),
            pl.BlockSpec((tk, tn), lambda i, j, k: (k, j)),
            pl.BlockSpec((1, tn), lambda i, j, k: (0, j)),
        ],
        out_specs=pl.BlockSpec((tm, tn), lambda i, j, k: (i, j)),
        scratch_shapes=[pltpu.VMEM((tm, tn), jnp.float32)],
        compiler_params=pltpu.CompilerParams(
            dimension_semantics=("parallel", "parallel", "arbitrary"),
            vmem_limit_bytes=_clamp_vmem(est)),
    )(x.astype(jnp.bfloat16), w.astype(jnp.bfloat16),
      b.reshape(1, N).astype(jnp.float32))


# ----------------------------- standalone (residual +) LayerNorm -----------------------------

def _ln_kernel(x_ref, g_ref, b_ref, o_ref, *, eps):
    o_ref[...] = _ln_math(x_ref[...].astype(jnp.float32), g_ref[...], b_ref[...],
                          eps).astype(o_ref.dtype)


def _add_ln_kernel(x_ref, r_ref, g_ref, b_ref, o_ref, *, eps):
    y = x_ref[...].astype(jnp.float32) + r_ref[...].astype(jnp.float32)
    o_ref[...] = _ln_math(y, g_ref[...], b_ref[...], eps).astype(o_ref.dtype)


def layernorm(x, gamma, beta, residual=None, eps=1e-12, out_dtype=jnp.bfloat16, tm=512):
    """LN(x) or LN(x + residual); pure HBM stream, 512-row tiles."""
    M, H = x.shape
    tm = _pick_tile(M, tm, _SUBLANE)
    g = gamma.reshape(1, H).astype(jnp.float32)
    b = beta.reshape(1, H).astype(jnp.float32)
    row = pl.BlockSpec((tm, H), lambda i: (i, 0))
    par = pl.BlockSpec((1, H), lambda i: (0, 0))
    if residual is None:
        kern, specs, args = _ln_kernel, [row, par, par], (x, g, b)
    else:
        kern, specs, args = _add_ln_kernel, [row, row, par, par], (x, residual, g, b)
    return pl.pallas_call(
        functools.partial(kern, eps=eps),
        out_shape=jax.ShapeDtypeStruct((M, H), out_dtype),
        grid=(M // tm,),
        in_specs=specs,
        out_specs=row,
        compiler_params=pltpu.CompilerParams(dimension_semantics=("parallel",)),
    )(*args)


# ----------------------------- weight-stationary fused linear -----------------------------

def _ws_vmem_bytes(tm, K, N, nh, has_res, has_head, out_dtype):
    est = 2 * tm * K * 2            # x double-buffer (bf16)
    est += 2 * K * N * 2            # resident weight (count 2 buffers, conservative)
    est += 2 * N * 4                # bias
    est += tm * N * 4               # f32 pre-LN intermediate
    est += 4 * N * 4                # LN gamma/beta
    if has_res:
        est += 2 * tm * N * 2
    if has_head:
        est += 2 * N * nh * 2 + 2 * nh * 4 + 2 * tm * nh * 4
    else:
        est += 2 * tm * N * jnp.dtype(out_dtype).itemsize
    return est


def linear_fused(x, w, b, *, activation="none", residual=None, ln_params=None,
                 head=None, eps=1e-12, out_dtype=jnp.bfloat16,
                 head_out_dtype=jnp.float32, tm_max=512):
    """y = act(x @ w + b) with an optional fused epilogue, weight-stationary when it fits.

      * residual / ln_params=(gamma, beta):  y = LayerNorm(y + residual)
      * head=(wh, bh):  return (y @ wh + bh) instead of y (y never hits HBM)

    Weight-stationary path: grid=(M/tm,), whole (K, N) weight resident in VMEM.
    Falls back to the K-accumulator tiling plus separate LN/head passes when the
    weight exceeds the VMEM budget.
    """
    M, K = x.shape
    N = w.shape[1]
    has_res = residual is not None
    has_ln = ln_params is not None
    has_head = head is not None
    nh = head[0].shape[1] if has_head else 0

    cands = [M] if M <= tm_max else []
    cands += [t for t in (1024, 512, 256, 128, 64, 32, 16, 8)
              if t <= min(M, tm_max) and M % t == 0]
    tm = None
    for t in cands:
        if _ws_vmem_bytes(t, K, N, nh, has_res, has_head, out_dtype) <= _WS_VMEM_BUDGET:
            tm = t
            break

    if tm is None:
        # Weight too large to hold resident: tile over K, epilogue un-fused.
        mid_dtype = jnp.bfloat16 if (has_ln or has_res or has_head) else out_dtype
        y = _tiled_linear(x, w, b, activation, mid_dtype)
        if has_ln:
            y = layernorm(y, ln_params[0], ln_params[1], residual=residual, eps=eps,
                          out_dtype=jnp.bfloat16 if has_head else out_dtype)
        elif has_res:
            y = (y.astype(jnp.float32) + residual.astype(jnp.float32)).astype(
                jnp.bfloat16 if has_head else out_dtype)
        if has_head:
            return linear_fused(y, head[0], head[1], out_dtype=head_out_dtype)
        return y

    # ---------------- weight-stationary fused path ----------------
    in_specs = [
        pl.BlockSpec((tm, K), lambda i: (i, 0)),
        pl.BlockSpec((K, N), lambda i: (0, 0)),      # resident weight (constant index)
        pl.BlockSpec((1, N), lambda i: (0, 0)),
    ]
    args = [x.astype(jnp.bfloat16), w.astype(jnp.bfloat16),
            b.reshape(1, N).astype(jnp.float32)]
    if has_res:
        in_specs.append(pl.BlockSpec((tm, N), lambda i: (i, 0)))
        args.append(residual)
    if has_ln:
        g, bt = ln_params
        in_specs += [pl.BlockSpec((1, N), lambda i: (0, 0)),
                     pl.BlockSpec((1, N), lambda i: (0, 0))]
        args += [g.reshape(1, N).astype(jnp.float32),
                 bt.reshape(1, N).astype(jnp.float32)]
    if has_head:
        wh, bh = head
        in_specs += [pl.BlockSpec((N, nh), lambda i: (0, 0)),
                     pl.BlockSpec((1, nh), lambda i: (0, 0))]
        args += [wh.astype(jnp.bfloat16), bh.reshape(1, nh).astype(jnp.float32)]

    if has_head:
        out_shape = jax.ShapeDtypeStruct((M, nh), head_out_dtype)
        out_spec = pl.BlockSpec((tm, nh), lambda i: (i, 0))
    else:
        out_shape = jax.ShapeDtypeStruct((M, N), out_dtype)
        out_spec = pl.BlockSpec((tm, N), lambda i: (i, 0))

    def kernel(*refs):
        it = iter(refs)
        x_ref, w_ref, b_ref = next(it), next(it), next(it)
        r_ref = next(it) if has_res else None
        g_ref = next(it) if has_ln else None
        bt_ref = next(it) if has_ln else None
        wh_ref = next(it) if has_head else None
        bh_ref = next(it) if has_head else None
        o_ref = next(it)

        y = jnp.dot(x_ref[...], w_ref[...], preferred_element_type=jnp.float32)
        y = y + b_ref[...]
        if activation == "gelu":
            # TODO(synk): erf GELU (approximate=False) for torch.nn.GELU bit-parity.
            y = jax.nn.gelu(y, approximate=True)
        elif activation == "tanh":
            y = jnp.tanh(y)
        if has_res:
            y = y + r_ref[...].astype(jnp.float32)
        if has_ln:
            y = _ln_math(y, g_ref[...], bt_ref[...], eps)
        if has_head:
            o_ref[...] = (jnp.dot(y.astype(jnp.bfloat16), wh_ref[...],
                                  preferred_element_type=jnp.float32)
                          + bh_ref[...]).astype(o_ref.dtype)
        else:
            o_ref[...] = y.astype(o_ref.dtype)

    est = _ws_vmem_bytes(tm, K, N, nh, has_res, has_head, out_dtype)
    return pl.pallas_call(
        kernel,
        out_shape=out_shape,
        grid=(M // tm,),
        in_specs=in_specs,
        out_specs=out_spec,
        compiler_params=pltpu.CompilerParams(
            dimension_semantics=("parallel",),
            vmem_limit_bytes=_clamp_vmem(est)),
    )(*args)


# ----------------------------- fused-QKV multi-head attention -----------------------------

def _attention_kernel(q_ref, kv_ref, mask_ref, o_ref, *, num_heads, head_dim, hidden,
                      scale):
    """One (batch, query-block) step: all heads, full-K softmax.

    q_ref:  (tq, 3H) rows of the fused QKV slab for this query block (Q in cols [0,H))
    kv_ref: (S,  3H) full-sequence slab for this batch (K in [H,2H), V in [2H,3H))
    Each head's context is written straight into its o_ref column slice (no concat).
    """
    # TODO(synk): flash-style online-softmax KV tiling for very long S (v7x 64 MiB).
    # TODO(synk): pack per-head Q/K/V columns 128-lane aligned (or batch two heads per
    #             dot_general) if the bundle shows XLU lane-realignment on dh=64 slices.
    mask = mask_ref[0].astype(jnp.float32)                      # (1, S) additive
    for h in range(num_heads):                                  # static unroll
        lo, hi = h * head_dim, (h + 1) * head_dim
        qh = q_ref[:, lo:hi]                                    # (tq, dh) bf16
        kh = kv_ref[:, hidden + lo:hidden + hi]                 # (S,  dh)
        vh = kv_ref[:, 2 * hidden + lo:2 * hidden + hi]         # (S,  dh)
        s = jax.lax.dot_general(qh, kh, (((1,), (1,)), ((), ())),
                                preferred_element_type=jnp.float32) * scale + mask
        s = s - jnp.max(s, axis=-1, keepdims=True)
        p = jnp.exp(s)
        p = p * pl.reciprocal(jnp.sum(p, axis=-1, keepdims=True), approx=True)
        o_ref[:, lo:hi] = jnp.dot(p.astype(vh.dtype), vh,
                                  preferred_element_type=jnp.float32
                                  ).astype(o_ref.dtype)


def attention(qkv, mask_add, num_heads, batch, seq_len, out_dtype=jnp.bfloat16, tq=256):
    """qkv: (B*S, 3H) fused projection; mask_add: (B, 1, S) additive mask."""
    M, three_h = qkv.shape
    H = three_h // 3
    dh = H // num_heads
    scale = 1.0 / float(dh) ** 0.5
    tq = _pick_tile(seq_len, tq, _SUBLANE)
    n_qblk = seq_len // tq
    est = (2 * tq * three_h * 2 + 2 * seq_len * three_h * 2 + 2 * seq_len * 4
           + 2 * tq * H * 2 + 2 * tq * seq_len * 4)
    return pl.pallas_call(
        functools.partial(_attention_kernel, num_heads=num_heads, head_dim=dh,
                          hidden=H, scale=scale),
        out_shape=jax.ShapeDtypeStruct((M, H), out_dtype),
        grid=(batch, n_qblk),
        in_specs=[
            pl.BlockSpec((tq, three_h), lambda b, q: (b * n_qblk + q, 0)),   # Q rows
            pl.BlockSpec((seq_len, three_h), lambda b, q: (b, 0)),           # K/V rows
            pl.BlockSpec((1, 1, seq_len), lambda b, q: (b, 0, 0)),           # mask
        ],
        out_specs=pl.BlockSpec((tq, H), lambda b, q: (b * n_qblk + q, 0)),
        compiler_params=pltpu.CompilerParams(
            dimension_semantics=("parallel", "parallel"),
            vmem_limit_bytes=_clamp_vmem(est)),
    )(qkv, qkv, mask_add)


# ----------------------------- fused start/end QA CE loss -----------------------------

def _qa_loss_kernel(logits_ref, pos_ref, sum_ref, cnt_ref, *, ignored_index):
    x = logits_ref[...].astype(jnp.float32)      # (2, B, S): row0=start, row1=end
    pos = pos_ref[...]                           # (2, B, 1) int32
    m = jnp.max(x, axis=-1, keepdims=True)
    lse = jnp.log(jnp.sum(jnp.exp(x - m), axis=-1, keepdims=True)) + m
    col = jax.lax.broadcasted_iota(jnp.int32, x.shape, 2)
    onehot = (col == pos).astype(jnp.float32)
    tgt = jnp.sum(x * onehot, axis=-1, keepdims=True)
    nll = lse - tgt                              # (2, B, 1)
    valid = (pos != ignored_index).astype(jnp.float32)
    B = x.shape[1]
    sum_ref[...] = jnp.sum((nll * valid).reshape(2, B), axis=-1, keepdims=True)
    cnt_ref[...] = jnp.sum(valid.reshape(2, B), axis=-1, keepdims=True)


def qa_loss(logits2, start_positions, end_positions, ignored_index):
    """nn.CrossEntropyLoss(ignore_index=S) over start & end logits, one pallas_call."""
    _, B, S = logits2.shape
    pos = jnp.stack([start_positions, end_positions], axis=0).reshape(2, B, 1)
    pos = jnp.clip(pos.astype(jnp.int32), 0, ignored_index)
    s, c = pl.pallas_call(
        functools.partial(_qa_loss_kernel, ignored_index=ignored_index),
        out_shape=(jax.ShapeDtypeStruct((2, 1), jnp.float32),
                   jax.ShapeDtypeStruct((2, 1), jnp.float32)),
        grid=(1,),
        in_specs=[
            pl.BlockSpec((2, B, S), lambda i: (0, 0, 0)),
            pl.BlockSpec((2, B, 1), lambda i: (0, 0, 0)),
        ],
        out_specs=(pl.BlockSpec((2, 1), lambda i: (0, 0)),
                   pl.BlockSpec((2, 1), lambda i: (0, 0))),
    )(logits2.astype(jnp.float32), pos)
    # PyTorch returns NaN when every target is ignored (0/0); guard to 0 explicitly.
    per = s[:, 0] / jnp.maximum(c[:, 0], 1.0)
    return (per[0] + per[1]) / 2.0


# ----------------------------- model (glue + kernels) -----------------------------

def init_params(key, vocab, n_seg, max_pos, H, nH, ffn):
    keys = jax.random.split(key, 12)

    def w(k, shape, scale=0.02, dtype=jnp.bfloat16):
        return (scale * jax.random.normal(k, shape)).astype(dtype)

    return {
        "num_heads": nH,
        # embeddings / LN params stay f32; matmul weights stored bf16 for the MXU.
        "word_emb": w(keys[0], (vocab, H), dtype=jnp.float32),
        "seg_emb": w(keys[1], (n_seg, H), dtype=jnp.float32),
        "pos_emb": w(keys[2], (max_pos, H), dtype=jnp.float32),
        "ln_emb_g": jnp.ones((H,), jnp.float32), "ln_emb_b": jnp.zeros((H,), jnp.float32),
        # fused QKV weight (H, 3H) = [Wq | Wk | Wv]
        "wqkv": w(keys[3], (H, 3 * H)), "bqkv": jnp.zeros((3 * H,), jnp.float32),
        "wo": w(keys[4], (H, H)), "bo": jnp.zeros((H,), jnp.float32),
        "ln1_g": jnp.ones((H,), jnp.float32), "ln1_b": jnp.zeros((H,), jnp.float32),
        "w1": w(keys[5], (H, ffn)), "b1": jnp.zeros((ffn,), jnp.float32),
        "w2": w(keys[6], (ffn, H)), "b2": jnp.zeros((H,), jnp.float32),
        "ln2_g": jnp.ones((H,), jnp.float32), "ln2_b": jnp.zeros((H,), jnp.float32),
        "wp": w(keys[7], (H, H)), "bp": jnp.zeros((H,), jnp.float32),  # pooler (unused by QAModel)
        "w_qa": w(keys[8], (H, 2)), "b_qa": jnp.zeros((2,), jnp.float32),
    }


def qa_model_forward(p, batch, compute_loss=False):
    """QAModel.forward: encoder -> QAHead -> (logits[, loss]).  pooled/'other' unused."""
    input_ids = batch["input_ids"]
    B, S = input_ids.shape
    H = p["word_emb"].shape[1]
    nH = p["num_heads"]

    # --- embeddings (plain-JAX gathers) + LN ---
    emb = (p["word_emb"][input_ids]
           + p["seg_emb"][batch["segment_ids"]]
           + p["pos_emb"][jnp.arange(S)][None, :, :])
    x = layernorm(emb.reshape(B * S, H), p["ln_emb_g"], p["ln_emb_b"])   # (B*S, H) bf16

    # --- self-attention block ---
    qkv = linear_fused(x, p["wqkv"], p["bqkv"])                          # (B*S, 3H)
    mask_add = (1.0 - batch["input_mask"].astype(jnp.float32))[:, None, :] * (-1e9)
    ctx = attention(qkv, mask_add, nH, B, S)                             # (B*S, H)
    # attention output projection with fused residual-add + LayerNorm
    x1 = linear_fused(ctx, p["wo"], p["bo"],
                      residual=x, ln_params=(p["ln1_g"], p["ln1_b"]))

    # --- FFN block; the 2nd matmul fuses add+LN and the 128-lane-padded QA head ---
    hmid = linear_fused(x1, p["w1"], p["b1"], activation="gelu")         # (B*S, ffn)
    w_qa_pad = jnp.pad(p["w_qa"].astype(jnp.bfloat16), ((0, 0), (0, 126)))
    b_qa_pad = jnp.pad(p["b_qa"].astype(jnp.float32), (0, 126))
    qa128 = linear_fused(hmid, p["w2"], p["b2"],
                         residual=x1, ln_params=(p["ln2_g"], p["ln2_b"]),
                         head=(w_qa_pad, b_qa_pad))                      # (B*S, 128) f32

    logits2 = qa128[:, :2].T.reshape(2, B, S)            # (2, B, S): row0=start, row1=end
    logits = jnp.transpose(logits2, (1, 0, 2))           # (B, 2, S) == PyTorch permute(0, 2, 1)
    if compute_loss:
        ignored_index = S                                # == start_logits.size(1)
        loss = qa_loss(logits2, batch["start_position"], batch["end_position"],
                       ignored_index)
        return logits, loss
    return logits


# ----------------------------- main -----------------------------

if __name__ == "__main__":
    B, S, H, nH, FFN, VOCAB, NSEG = 2, 8, 32, 4, 64, 50, 2

    root = jax.random.PRNGKey(0)
    k_params, k_ids, k_start, k_end = jax.random.split(root, 4)

    params = init_params(k_params, VOCAB, NSEG, S, H, nH, FFN)

    input_ids = jax.random.randint(k_ids, (B, S), 0, VOCAB, dtype=jnp.int32)
    segment_ids = jnp.zeros((B, S), jnp.int32)
    input_mask = jnp.ones((B, S), jnp.int32).at[1, 6:].set(0)
    start_position = jax.random.randint(k_start, (B,), 0, S, dtype=jnp.int32)
    end_position = jax.random.randint(k_end, (B,), 0, S, dtype=jnp.int32)

    batch = dict(input_ids=input_ids, segment_ids=segment_ids, input_mask=input_mask,
                 start_position=start_position, end_position=end_position)

    logits, loss = qa_model_forward(params, batch, compute_loss=True)
    jax.block_until_ready((logits, loss))

    assert logits.shape == (B, 2, S)
    assert logits.dtype == jnp.float32
    assert jnp.isfinite(loss)
    print("KERNEL_OK")
</pallas_src>

<mosaic_0001>
module attributes {stable_mosaic.version = 11 : i64} {
  func.func @_ln_kernel(%arg0: i32, %arg1: memref<16x32xf32, #tpu.memory_space<vmem>>, %arg2: memref<1x32xf32, #tpu.memory_space<vmem>>, %arg3: memref<1x32xf32, #tpu.memory_space<vmem>>, %arg4: memref<16x32xbf16, #tpu.memory_space<vmem>>) attributes {dimension_semantics = [#tpu.dimension_semantics<parallel>], iteration_bounds = array<i64: 1>, scalar_prefetch = 0 : i64, scratch_operands = 0 : i64, tpu.core_type = #tpu.core_type<tc>, window_params = [{transform_indices = @transform_0, window_bounds = array<i64: 16, 32>}, {pipeline_mode = #tpu.pipeline_mode<synchronous>, transform_indices = @transform_1, window_bounds = array<i64: 1, 32>}, {pipeline_mode = #tpu.pipeline_mode<synchronous>, transform_indices = @transform_2, window_bounds = array<i64: 1, 32>}, {transform_indices = @transform_3, window_bounds = array<i64: 16, 32>}]} {
    %c0 = arith.constant 0 : index
    %c0_0 = arith.constant 0 : index
    %0 = vector.load %arg1[%c0, %c0_0] : memref<16x32xf32, #tpu.memory_space<vmem>>, vector<16x32xf32>
    %c0_1 = arith.constant 0 : index
    %c0_2 = arith.constant 0 : index
    %1 = vector.load %arg2[%c0_1, %c0_2] : memref<1x32xf32, #tpu.memory_space<vmem>>, vector<1x32xf32>
    %c0_3 = arith.constant 0 : index
    %c0_4 = arith.constant 0 : index
    %2 = vector.load %arg3[%c0_3, %c0_4] : memref<1x32xf32, #tpu.memory_space<vmem>>, vector<1x32xf32>
    %cst = arith.constant dense<0.000000e+00> : vector<16xf32>
    %3 = vector.multi_reduction <add>, %0, %cst [1] : vector<16x32xf32> to vector<16xf32>
    %4 = vector.shape_cast %3 : vector<16xf32> to vector<16x1xf32>
    %cst_5 = arith.constant 3.200000e+01 : f32
    %5 = vector.broadcast %cst_5 : f32 to vector<16x1xf32>
    %6 = arith.divf %4, %5 : vector<16x1xf32>
    %7 = vector.broadcast %6 : vector<16x1xf32> to vector<16x32xf32>
    %8 = arith.subf %0, %7 : vector<16x32xf32>
    %9 = arith.mulf %8, %8 : vector<16x32xf32>
    %cst_6 = arith.constant dense<0.000000e+00> : vector<16xf32>
    %10 = vector.multi_reduction <add>, %9, %cst_6 [1] : vector<16x32xf32> to vector<16xf32>
    %11 = vector.shape_cast %10 : vector<16xf32> to vector<16x1xf32>
    %cst_7 = arith.constant 3.200000e+01 : f32
    %12 = vector.broadcast %cst_7 : f32 to vector<16x1xf32>
    %13 = arith.divf %11, %12 : vector<16x1xf32>
    %14 = vector.broadcast %6 : vector<16x1xf32> to vector<16x32xf32>
    %15 = arith.subf %0, %14 : vector<16x32xf32>
    %cst_8 = arith.constant 9.99999996E-13 : f32
    %16 = vector.broadcast %cst_8 : f32 to vector<16x1xf32>
    %17 = arith.addf %13, %16 : vector<16x1xf32>
    %18 = math.rsqrt %17 : vector<16x1xf32>
    %19 = vector.broadcast %18 : vector<16x1xf32> to vector<16x32xf32>
    %20 = arith.mulf %15, %19 : vector<16x32xf32>
    %21 = vector.broadcast %1 : vector<1x32xf32> to vector<16x32xf32>
    %22 = arith.mulf %20, %21 : vector<16x32xf32>
    %23 = vector.broadcast %2 : vector<1x32xf32> to vector<16x32xf32>
    %24 = arith.addf %22, %23 : vector<16x32xf32>
    %25 = arith.truncf %24 : vector<16x32xf32> to vector<16x32xbf16>
    %c0_9 = arith.constant 0 : index
    %c0_10 = arith.constant 0 : index
    %26 = vector.load %arg4[%c0_9, %c0_10] : memref<16x32xbf16, #tpu.memory_space<vmem>>, vector<16x32xbf16>
    tpu.vector_store %arg4[%c0_9, %c0_10], %25 {strides = array<i32>} : memref<16x32xbf16, #tpu.memory_space<vmem>>, vector<16x32xbf16>,
    return
  }
  func.func @transform_0(%arg0: i32) -> (i32, i32) {
    %c0_i32 = arith.constant 0 : i32
    %c0_i32_0 = arith.constant 0 : i32
    return %arg0, %c0_i32 : i32, i32
  }
  func.func @transform_1(%arg0: i32) -> (i32, i32) {
    %c0_i32 = arith.constant 0 : i32
    %c0_i32_0 = arith.constant 0 : i32
    %c0_i32_1 = arith.constant 0 : i32
    return %c0_i32, %c0_i32_0 : i32, i32
  }
  func.func @transform_2(%arg0: i32) -> (i32, i32) {
    %c0_i32 = arith.constant 0 : i32
    %c0_i32_0 = arith.constant 0 : i32
    %c0_i32_1 = arith.constant 0 : i32
    return %c0_i32, %c0_i32_0 : i32, i32
  }
  func.func @transform_3(%arg0: i32) -> (i32, i32) {
    %c0_i32 = arith.constant 0 : i32
    %c0_i32_0 = arith.constant 0 : i32
    return %arg0, %c0_i32 : i32, i32
  }
}

</mosaic_0001>

<bundles_post_ra>
// kernel: tpu_custom_call.1
= control target key start
LH: loop header
LB: loop body
LE: loop exit
PB: predicated region body
PF: predicated region fallthrough
CT: control target
= control target key end

     0   :  { %8 = vsyncpa [#allocation3], 0  ;;  %s207_s0 = inlined_call_operand.hbm [shape: f32[16,32], index: 0, kind: input, shape index: {}]   ;;  %s208_s1 = inlined_call_operand.vmem [shape: f32[1,32], index: 1, kind: input, shape index: {}]   ;;  %s209_s2 = inlined_call_operand.vmem [shape: f32[1,32], index: 2, kind: input, shape index: {}]   ;;  %s210_s3 = inlined_call_operand.hbm [shape: bf16[16,32], index: 3, kind: output, shape index: {}]  }
   0x1   :  { %9 = vsyncpa [#allocation4], 0  ;;  %s165_s12 = smov [#allocation2]  }
   0x2   :  { %s15_s13 = sshll.u32 %s165_s12, 4  ;;  %s16_s13 = int_to_ptr.vmem [resolvable:$true] %s15_s13 }
   0x3   :  { %s129_s14 = scalar_lea.vmem %s16_s13, 256  ;;  %p134_p1 = scmp.lt.s32.totalorder %s16_s13, %s16_s13 }
   0x4   :  { %p130_p0 = scmp.ne.s32.totalorder %s16_s13, %s129_s14  ;;  %p135_p2 = scmp.lt.s32.totalorder %s129_s14, %s129_s14 }
   0x6   :  { %p136_p3 = por %p135_p2, %p134_p1 }
   0x8   :  { %p137_p4 = pnand %p136_p3, %p130_p0 }
   0xa   :  { %140 = shalt.err (!%p137_p4)
}
   0xb   :  { %s166_s15 = smov 128   ;;  %s167_s16 = smov 8  }
   0xc   :  { %21 = dma.hbm_to_vmem [thread:$0]  %s207_s0, 256, %s16_s13, [#allocation3], %s166_s15, %s166_s15, %s167_s16  }
   0xd   :  { %161 = dma.done.wait [#allocation3], 256  }
   0xe   :  { %162 = vsyncadd [#allocation3], 4294967040  ;;  %vm33_vm0 = vcmask 261120   ;;  %v29_v0 = vld [vmem:[#allocation2] sm:$0xff]  ;;  %v30_v1 = vld [vmem:[#allocation2 + $0x8] sm:$0xff]  ;;  %vm85_vm1 = vcmask 257024  }
   0xf   :  { %v34_v2 = vsel %vm33_vm0, %v29_v0, 0.0  ;;  %v37_v3 = vsel %vm33_vm0, %v30_v1, 0.0  ;;  %v105_v21 = vld [vmem:[%s208_s1] ss:$0 sm:$0xff]  ;;  %s168_s22 = smov [#allocation5]  }
  0x10   :  { %35 = vadd.xlane.f32.xlu0 %v34_v2  ;;  %v106_v23 = vld [vmem:[%s209_s2] ss:$0 sm:$0xff]  ;;  %s93_s23 = sshll.u32 %s168_s22, 4  ;;  %s94_s23 = int_to_ptr.vmem [resolvable:$true] %s93_s23 }
  0x11   :  { %s141_s1 = scalar_lea.vmem %s94_s23, 128  ;;  %p146_p6 = scmp.lt.s32.totalorder %s94_s23, %s94_s23 }
  0x12   :  { %p142_p5 = scmp.ne.s32.totalorder %s94_s23, %s141_s1  ;;  %p147_p7 = scmp.lt.s32.totalorder %s141_s1, %s141_s1 }
  0x14   :  { %38 = vadd.xlane.f32.xlu0 %v37_v3  ;;  %p148_p8 = por %p147_p7, %p146_p6 }
  0x16   :  { %p149_p9 = pnand %p148_p8, %p142_p5 }
  0x99   :  { %v36_v4 = vpop.xlane.xlu0 %35 }
  0x9a   :  { %v41_v5 = vmul.f32 0.03125, %v36_v4 }
  0x9c   :  { %v43_v6 = vsub.f32 %v29_v0, %v41_v5 }
  0x9d   :  { %v39_v7 = vpop.xlane.xlu0 %38 }
  0x9e   :  { %v42_v8 = vmul.f32 0.03125, %v39_v7  ;;  %v45_v9 = vmul.f32 %v43_v6, %v43_v6 }
  0xa0   :  { %v44_v10 = vsub.f32 %v30_v1, %v42_v8  ;;  %v47_v11 = vsel %vm33_vm0, %v45_v9, 0.0 }
  0xa1   :  { %48 = vadd.xlane.f32.xlu1 %v47_v11 }
  0xa2   :  { %v46_v12 = vmul.f32 %v44_v10, %v44_v10 }
  0xa4   :  { %v50_v13 = vsel %vm33_vm0, %v46_v12, 0.0 }
  0xa5   :  { %51 = vadd.xlane.f32.xlu1 %v50_v13 }
 0x12a   :  { %v49_v14 = vpop.xlane.xlu1 %48 }
 0x12b   :  { %v53_v15 = vmul.f32 0.03125, %v49_v14 }
 0x12d   :  { %v55_v16 = vadd.f32 1e-12, %v53_v15 }
 0x12e   :  { %v52_v17 = vpop.xlane.xlu1 %51 }
 0x12f   :  { %117 = vrsqrt.f32 %v55_v16  ;;  %v54_v18 = vmul.f32 0.03125, %v52_v17 }
 0x131   :  { %v56_v19 = vadd.f32 1e-12, %v54_v18 }
 0x133   :  { %119 = vrsqrt.f32 %v56_v19 }
 0x13c   :  { %v118_v20 = vpop.eup %117 }
 0x13d   :  { %v59_v22 = vmul.f32 %v118_v20, %v43_v6 }
 0x13f   :  { %v67_v24 = vmul.f32 %v105_v21, %v59_v22 }
 0x140   :  { %v120_v25 = vpop.eup %119 }
 0x141   :  { %v60_v26 = vmul.f32 %v120_v25, %v44_v10  ;;  %v75_v27 = vadd.f32 %v106_v23, %v67_v24 }
 0x143   :  { %v68_v28 = vmul.f32 %v105_v21, %v60_v26  ;;  %v109_v29 = vpack.c.bf16 %v75_v27, %v75_v27 }
 0x145   :  { %v76_v30 = vadd.f32 %v106_v23, %v68_v28  ;;  %86 = vst.msk [vmem:[#allocation5] sm:$0xf] %vm85_vm1, %v109_v29 }
 0x147   :  { %v110_v31 = vpack.c.bf16 %v76_v30, %v76_v30 }
 0x149   :  { %87 = vst.msk [vmem:[#allocation5 + $0x4] sm:$0xf] %vm85_vm1, %v110_v31 }
 0x14a   :  { %152 = shalt.err (!%p149_p9)
}
 0x14b   :  { %s169_s2 = smov 64   ;;  %s170_s24 = smov 4  }
 0x14c   :  { %99 = dma.vmem_to_hbm [thread:$0]  %s94_s23, 128, %s210_s3, [#allocation4], %s169_s2, %s169_s2, %s170_s24  }
 0x14d   :  { %163 = dma.done.wait [#allocation4], 128  }
 0x14e   :  { %164 = vsyncadd [#allocation4], 4294967168 }
 0x14f   :  { %103 = vsyncpa [#allocation3], 1 }
 0x150   :  { %104 = vsyncpa [#allocation4], 1 }

</bundles_post_ra>
